<compile_context>
chip_gen: v7x
topology: tpu7x:2x2x1
jax: 0.10.0
libtpu: 0.0.40
codegen_flags: <defaults>
</compile_context>

<pallas_src>
import jax
import jax.numpy as jnp
import numpy as np
from jax import lax
from jax.experimental import pallas as pl
from jax.experimental.pallas import tpu as pltpu

EMBED_DIM = 32


def _round_up(x, m):
    return (x + m - 1) // m * m


def _full_spec(shape):
    # whole-array block (satisfies TPU tiling rule: block == full array dims)
    return pl.BlockSpec(shape, lambda i, _s=shape: tuple(0 for _ in _s))


# ----------------------------- fused kernel ----------------------------------

def episode_kernel(x_ref, w_ref, b_ref, pw_ref, ic_ref, out_ref):
    """Fused episode: one backbone matmul -> prototypes -> -cdist.

    x_ref  : (R_pad, F)     bf16  fused rows: [query | support | zero pad] images
    w_ref  : (F, D_pad)     bf16  backbone weight (zero-padded columns)
    b_ref  : (1, D_pad)     f32   backbone bias   (zero-padded entries)
    pw_ref : (P_pad, R_pad) f32   exact 0/1 one-hot selecting the support rows
    ic_ref : (P_pad, 1)     f32   1 / |class p|   (1 for padded classes)
    out_ref: (N_pad, P_pad) f32   -euclidean distance for the leading rows
    """
    # Single F=1024 contraction for query+support rows (the only real compute):
    # bf16 MXU operands with f32 accumulation; bias + ReLU in f32 (v5e-safe).
    latent = jnp.maximum(
        jnp.dot(x_ref[...], w_ref[...], preferred_element_type=jnp.float32)
        + b_ref[...], 0.0)                                    # (R_pad, D_pad) f32

    # prototypes = one-hot @ latent (tiny (P,R)x(R,D) matmul: keep it in f32,
    # no cast passes), then exact f32 per-class mean normalization.
    protos = ic_ref[...] * jnp.dot(pw_ref[...], latent,
                                   preferred_element_type=jnp.float32)  # (P_pad, D_pad)

    # Query latents are the leading sublane-aligned rows of the fused latent.
    # Rows beyond the true query count (support rows / padding) yield garbage
    # distances that the wrapper slices off with out[:n, :num_classes] --
    # keep that invariant if the layout changes.
    lq = latent[:out_ref.shape[0], :]                          # (N_pad, D_pad)

    # -cdist via ||q||^2 + ||p||^2 - 2 q.p, all in f32.
    q2 = jnp.sum(lq * lq, axis=-1, keepdims=True)              # (N_pad, 1)
    # ||p||^2 lane-major via a ones-row matmul: produces a lane-resident
    # (1, P_pad) row directly (no XLU cross-lane reduce + relayout).
    ones_row = jnp.ones((1, protos.shape[-1]), jnp.float32)
    p2 = lax.dot_general(ones_row, protos * protos,
                         dimension_numbers=(((1,), (1,)), ((), ())),
                         preferred_element_type=jnp.float32)   # (1, P_pad)
    # cross term contracts the last dims of both operands (no physical
    # transpose of the prototype tile), f32 end-to-end.
    cross = lax.dot_general(lq, protos,
                            dimension_numbers=(((1,), (1,)), ((), ())),
                            preferred_element_type=jnp.float32)  # (N_pad, P_pad)
    d2 = jnp.maximum(q2 + p2 - 2.0 * cross, 0.0)
    out_ref[...] = -jnp.sqrt(d2)


# ----------------------------- wrapper ----------------------------------------

def prototypical_forward(query_imgs, support_imgs, support_labels, w, b,
                         num_classes):
    """Whole episode (compute_prototypes + forward) in one pallas_call."""
    n = query_imgs.shape[0]
    s = support_imgs.shape[0]
    f = int(np.prod(query_imgs.shape[1:]))
    d = w.shape[1]

    # sublane (row) dims padded to multiples of 8; embedding lane dim to 128
    n_pad = _round_up(max(n, 8), 8)
    r_pad = _round_up(max(n + s, 8), 8)           # fused query+support rows
    p_pad = _round_up(max(num_classes, 8), 8)
    d_pad = _round_up(max(d, 128), 128)

    # Fused operand: query rows at [0, n), support rows at [n, n+s), zero pad.
    x = jnp.zeros((r_pad, f), jnp.bfloat16)
    x = x.at[:n].set(query_imgs.reshape(n, f).astype(jnp.bfloat16))
    x = x.at[n:n + s].set(support_imgs.reshape(s, f).astype(jnp.bfloat16))

    # Padded weight columns / bias entries are zero -> padded embedding dims
    # are exactly 0 and contribute nothing to q2 / p2 / cross.
    w_p = jnp.zeros((f, d_pad), jnp.bfloat16).at[:, :d].set(w.astype(jnp.bfloat16))
    b_p = jnp.zeros((1, d_pad), jnp.float32).at[:, :d].set(
        b.astype(jnp.float32).reshape(1, d))

    # Exact 0/1 one-hot over the fused rows (query / padded columns stay zero)
    # plus f32 inverse class counts applied after the MXU (exact per-class mean
    # for any shot count).
    onehot = (support_labels[None, :] ==
              jnp.arange(p_pad, dtype=support_labels.dtype)[:, None]
              ).astype(jnp.float32)                              # (p_pad, s)
    pw = jnp.zeros((p_pad, r_pad), jnp.float32).at[:, n:n + s].set(onehot)
    inv_counts = 1.0 / jnp.maximum(onehot.sum(axis=1, keepdims=True), 1.0)

    out = pl.pallas_call(
        episode_kernel,
        out_shape=jax.ShapeDtypeStruct((n_pad, p_pad), jnp.float32),
        grid=(1,),
        in_specs=[_full_spec((r_pad, f)), _full_spec((f, d_pad)),
                  _full_spec((1, d_pad)), _full_spec((p_pad, r_pad)),
                  _full_spec((p_pad, 1))],
        out_specs=_full_spec((n_pad, p_pad)),
        # "parallel" so that a future batched row/episode axis shards across
        # v7x's two TensorCores; no effect at grid=(1,) or on v5e/v6e.
        compiler_params=pltpu.CompilerParams(
            dimension_semantics=("parallel",)),
    )(x, w_p, b_p, pw, inv_counts)

    return out[:n, :num_classes]


# ----------------------------- reference (f32) --------------------------------

def ref_forward(query, support, labels, w, b, num_classes):
    def embed(x):
        xf = x.reshape(x.shape[0], -1)
        return jnp.maximum(xf @ w + b, 0.0)
    ls = embed(support)
    oh = (labels[:, None] == jnp.arange(num_classes)[None, :]).astype(jnp.float32)
    protos = (oh.T @ ls) / oh.sum(0)[:, None]
    lq = embed(query)
    dist = jnp.sqrt(jnp.maximum(
        jnp.sum((lq[:, None, :] - protos[None, :, :]) ** 2, axis=-1), 0.0))
    return -dist


# ------------------------------- main ------------------------------------------

if __name__ == "__main__":
    key = jax.random.PRNGKey(0)
    k_q, k_s, k_w, k_b = jax.random.split(key, 4)

    C, H, W = 4, 16, 16
    F = C * H * W                      # 1024 (multiple of 128 -> lane friendly)
    num_classes = 5
    shots = 2

    query_imgs = jax.random.normal(k_q, (2, C, H, W), dtype=jnp.float32)
    support_imgs = jax.random.normal(k_s, (num_classes * shots, C, H, W),
                                     dtype=jnp.float32)
    support_labels = jnp.repeat(jnp.arange(num_classes, dtype=jnp.int32), shots)

    # deterministic synthetic backbone parameters (Linear F -> EMBED_DIM)
    # TODO(synk): the PyTorch module takes an arbitrary nn.Module backbone and
    # infers num_classes via torch.unique (data-dependent); here the backbone is
    # a fixed Linear+ReLU and num_classes is static.
    w = jax.random.normal(k_w, (F, EMBED_DIM), dtype=jnp.float32) * 0.02
    b = jax.random.normal(k_b, (1, EMBED_DIM), dtype=jnp.float32) * 0.02

    scores = prototypical_forward(query_imgs, support_imgs, support_labels,
                                  w, b, num_classes)
    scores = jax.block_until_ready(scores)

    expected = ref_forward(query_imgs, support_imgs, support_labels, w, b,
                           num_classes)
    # Tolerance tightened vs. the previous version: only the F=1024 backbone
    # contraction uses bf16 operands (f32 accumulation); the prototype mean,
    # cross term and norms are all f32.
    np.testing.assert_allclose(np.asarray(scores), np.asarray(expected),
                               rtol=5e-3, atol=5e-3)

    print("KERNEL_OK")
</pallas_src>

<mosaic_0001>
module attributes {stable_mosaic.version = 11 : i64} {
  func.func @episode_kernel(%arg0: i32, %arg1: memref<16x1024xbf16, #tpu.memory_space<vmem>>, %arg2: memref<1024x128xbf16, #tpu.memory_space<vmem>>, %arg3: memref<1x128xf32, #tpu.memory_space<vmem>>, %arg4: memref<8x16xf32, #tpu.memory_space<vmem>>, %arg5: memref<8x1xf32, #tpu.memory_space<vmem>>, %arg6: memref<8x8xf32, #tpu.memory_space<vmem>>) attributes {dimension_semantics = [#tpu.dimension_semantics<parallel>], iteration_bounds = array<i64: 1>, scalar_prefetch = 0 : i64, scratch_operands = 0 : i64, tpu.core_type = #tpu.core_type<tc>, window_params = [{pipeline_mode = #tpu.pipeline_mode<synchronous>, transform_indices = @transform_0, window_bounds = array<i64: 16, 1024>}, {pipeline_mode = #tpu.pipeline_mode<synchronous>, transform_indices = @transform_1, window_bounds = array<i64: 1024, 128>}, {pipeline_mode = #tpu.pipeline_mode<synchronous>, transform_indices = @transform_2, window_bounds = array<i64: 1, 128>}, {pipeline_mode = #tpu.pipeline_mode<synchronous>, transform_indices = @transform_3, window_bounds = array<i64: 8, 16>}, {pipeline_mode = #tpu.pipeline_mode<synchronous>, transform_indices = @transform_4, window_bounds = array<i64: 8, 1>}, {pipeline_mode = #tpu.pipeline_mode<synchronous>, transform_indices = @transform_5, window_bounds = array<i64: 8, 8>}]} {
    %c0 = arith.constant 0 : index
    %c0_0 = arith.constant 0 : index
    %0 = vector.load %arg1[%c0, %c0_0] : memref<16x1024xbf16, #tpu.memory_space<vmem>>, vector<16x1024xbf16>
    %c0_1 = arith.constant 0 : index
    %c0_2 = arith.constant 0 : index
    %1 = vector.load %arg2[%c0_1, %c0_2] : memref<1024x128xbf16, #tpu.memory_space<vmem>>, vector<1024x128xbf16>
    %cst = arith.constant dense<0.000000e+00> : vector<16x128xf32>
    %2 = tpu.matmul %0, %1, %cst {dimension_numbers = #tpu.dot_dimension_numbers<[1], [0], [0], [1], [0, 0, 1, 1], [], []>} : vector<16x1024xbf16>, vector<1024x128xbf16>, vector<16x128xf32> -> vector<16x128xf32>
    %c0_3 = arith.constant 0 : index
    %c0_4 = arith.constant 0 : index
    %3 = vector.load %arg3[%c0_3, %c0_4] : memref<1x128xf32, #tpu.memory_space<vmem>>, vector<1x128xf32>
    %4 = vector.broadcast %3 : vector<1x128xf32> to vector<16x128xf32>
    %5 = arith.addf %2, %4 : vector<16x128xf32>
    %cst_5 = arith.constant 0.000000e+00 : f32
    %6 = vector.broadcast %cst_5 : f32 to vector<16x128xf32>
    %7 = arith.maximumf %5, %6 : vector<16x128xf32>
    %c0_6 = arith.constant 0 : index
    %c0_7 = arith.constant 0 : index
    %8 = vector.load %arg5[%c0_6, %c0_7] : memref<8x1xf32, #tpu.memory_space<vmem>>, vector<8x1xf32>
    %c0_8 = arith.constant 0 : index
    %c0_9 = arith.constant 0 : index
    %9 = vector.load %arg4[%c0_8, %c0_9] : memref<8x16xf32, #tpu.memory_space<vmem>>, vector<8x16xf32>
    %cst_10 = arith.constant dense<0.000000e+00> : vector<8x128xf32>
    %10 = tpu.matmul %9, %7, %cst_10 {dimension_numbers = #tpu.dot_dimension_numbers<[1], [0], [0], [1], [0, 0, 1, 1], [], []>} : vector<8x16xf32>, vector<16x128xf32>, vector<8x128xf32> -> vector<8x128xf32>
    %11 = vector.broadcast %8 : vector<8x1xf32> to vector<8x128xf32>
    %12 = arith.mulf %11, %10 : vector<8x128xf32>
    %13 = vector.extract_strided_slice %7 {offsets = [0, 0], sizes = [8, 128], strides = [1, 1]} : vector<16x128xf32> to vector<8x128xf32>
    %14 = arith.mulf %13, %13 : vector<8x128xf32>
    %cst_11 = arith.constant dense<0.000000e+00> : vector<8xf32>
    %15 = vector.multi_reduction <add>, %14, %cst_11 [1] : vector<8x128xf32> to vector<8xf32>
    %16 = vector.shape_cast %15 : vector<8xf32> to vector<8x1xf32>
    %cst_12 = arith.constant 1.000000e+00 : f32
    %17 = vector.broadcast %cst_12 : f32 to vector<1x128xf32>
    %18 = arith.mulf %12, %12 : vector<8x128xf32>
    %cst_13 = arith.constant dense<0.000000e+00> : vector<1x8xf32>
    %19 = tpu.matmul %17, %18, %cst_13 {dimension_numbers = #tpu.dot_dimension_numbers<[1], [1], [0], [0], [0, 0, 1, 0], [], []>} : vector<1x128xf32>, vector<8x128xf32>, vector<1x8xf32> -> vector<1x8xf32>
    %cst_14 = arith.constant dense<0.000000e+00> : vector<8x8xf32>
    %20 = tpu.matmul %13, %12, %cst_14 {dimension_numbers = #tpu.dot_dimension_numbers<[1], [1], [0], [0], [0, 0, 1, 0], [], []>} : vector<8x128xf32>, vector<8x128xf32>, vector<8x8xf32> -> vector<8x8xf32>
    %21 = vector.broadcast %16 : vector<8x1xf32> to vector<8x8xf32>
    %22 = vector.broadcast %19 : vector<1x8xf32> to vector<8x8xf32>
    %23 = arith.addf %21, %22 : vector<8x8xf32>
    %cst_15 = arith.constant 2.000000e+00 : f32
    %24 = vector.broadcast %cst_15 : f32 to vector<8x8xf32>
    %25 = arith.mulf %24, %20 : vector<8x8xf32>
    %26 = arith.subf %23, %25 : vector<8x8xf32>
    %cst_16 = arith.constant 0.000000e+00 : f32
    %27 = vector.broadcast %cst_16 : f32 to vector<8x8xf32>
    %28 = arith.maximumf %26, %27 : vector<8x8xf32>
    %29 = math.sqrt %28 : vector<8x8xf32>
    %cst_17 = arith.constant 0.000000e+00 : f32
    %30 = vector.broadcast %cst_17 : f32 to vector<8x8xf32>
    %31 = arith.subf %30, %29 : vector<8x8xf32>
    %c0_18 = arith.constant 0 : index
    %c0_19 = arith.constant 0 : index
    %32 = vector.load %arg6[%c0_18, %c0_19] : memref<8x8xf32, #tpu.memory_space<vmem>>, vector<8x8xf32>
    tpu.vector_store %arg6[%c0_18, %c0_19], %31 {strides = array<i32>} : memref<8x8xf32, #tpu.memory_space<vmem>>, vector<8x8xf32>,
    return
  }
  func.func @transform_0(%arg0: i32) -> (i32, i32) {
    %c0_i32 = arith.constant 0 : i32
    %c0_i32_0 = arith.constant 0 : i32
    %c0_i32_1 = arith.constant 0 : i32
    return %c0_i32, %c0_i32_0 : i32, i32
  }
  func.func @transform_1(%arg0: i32) -> (i32, i32) {
    %c0_i32 = arith.constant 0 : i32
    %c0_i32_0 = arith.constant 0 : i32
    %c0_i32_1 = arith.constant 0 : i32
    return %c0_i32, %c0_i32_0 : i32, i32
  }
  func.func @transform_2(%arg0: i32) -> (i32, i32) {
    %c0_i32 = arith.constant 0 : i32
    %c0_i32_0 = arith.constant 0 : i32
    %c0_i32_1 = arith.constant 0 : i32
    return %c0_i32, %c0_i32_0 : i32, i32
  }
  func.func @transform_3(%arg0: i32) -> (i32, i32) {
    %c0_i32 = arith.constant 0 : i32
    %c0_i32_0 = arith.constant 0 : i32
    %c0_i32_1 = arith.constant 0 : i32
    return %c0_i32, %c0_i32_0 : i32, i32
  }
  func.func @transform_4(%arg0: i32) -> (i32, i32) {
    %c0_i32 = arith.constant 0 : i32
    %c0_i32_0 = arith.constant 0 : i32
    %c0_i32_1 = arith.constant 0 : i32
    return %c0_i32, %c0_i32_0 : i32, i32
  }
  func.func @transform_5(%arg0: i32) -> (i32, i32) {
    %c0_i32 = arith.constant 0 : i32
    %c0_i32_0 = arith.constant 0 : i32
    %c0_i32_1 = arith.constant 0 : i32
    return %c0_i32, %c0_i32_0 : i32, i32
  }
}

</mosaic_0001>

<bundles_post_ra>
// kernel: tpu_custom_call.1
= control target key start
LH: loop header
LB: loop body
LE: loop exit
PB: predicated region body
PF: predicated region fallthrough
CT: control target
= control target key end

     0   :  { %10 = vsyncpa [#allocation3], 0  ;;  %s1473_s0 = inlined_call_operand.hbm [shape: bf16[16,1024], index: 0, kind: input, shape index: {}]   ;;  %s1474_s1 = inlined_call_operand.hbm [shape: bf16[1024,128], index: 1, kind: input, shape index: {}]   ;;  %s1475_s2 = inlined_call_operand.vmem [shape: f32[1,128], index: 2, kind: input, shape index: {}]   ;;  %s1476_s3 = inlined_call_operand.vmem [shape: f32[8,16], index: 3, kind: input, shape index: {}]   ;;  %s1477_s4 = inlined_call_operand.vmem [shape: f32[8,1], index: 4, kind: input, shape index: {}]   ;;  %s1478_s5 = inlined_call_operand.hbm [shape: f32[8,8], index: 5, kind: output, shape index: {}]  }
   0x1   :  { %11 = vsyncpa [#allocation6], 0 }
   0x2   :  { %12 = vsyncpa [#allocation4], 0  ;;  %s1383_s18 = smov [#allocation2]   ;;  %s1311_s22 = scalar_lea.hbm %s1473_s0, 1024 }
   0x3   :  { %s18_s19 = sshll.u32 %s1383_s18, 4  ;;  %p1312_p0 = scmp.ne.s32.totalorder %s1473_s0, %s1311_s22  ;;  %s19_s19 = int_to_ptr.vmem [resolvable:$true] %s18_s19 }
   0x4   :  { %p1315_p1 = scmp.lt.u32.totalorder %s1311_s22, %s1473_s0 }
   0x6   :  { %p1317_p2 = pnand %p1315_p1, %p1312_p0 }
   0x8   :  { %1320 = shalt.err (!%p1317_p2)
}
   0x9   :  { %s1321_s27 = scalar_lea.vmem %s19_s19, 1024  ;;  %p1326_p4 = scmp.lt.s32.totalorder %s19_s19, %s19_s19 }
   0xa   :  { %p1322_p3 = scmp.ne.s32.totalorder %s19_s19, %s1321_s27  ;;  %p1327_p5 = scmp.lt.s32.totalorder %s1321_s27, %s1321_s27 }
   0xc   :  { %p1328_p6 = por %p1327_p5, %p1326_p4 }
   0xe   :  { %p1329_p7 = pnand %p1328_p6, %p1322_p3 }
  0x10   :  { %1332 = shalt.err (!%p1329_p7)
}
  0x11   :  { %s1384_s28 = smov 512   ;;  %s1385_s29 = smov 32  }
  0x12   :  { %24 = dma.hbm_to_vmem [thread:$0]  %s1473_s0, 1024, %s19_s19, [#allocation3], %s1384_s28, %s1384_s28, %s1385_s29  }
  0x13   :  { %s1386_s7 = smov [#allocation5]   ;;  %s1333_s11 = scalar_lea.hbm %s1474_s1, 8192 }
  0x14   :  { %s30_s8 = sshll.u32 %s1386_s7, 4  ;;  %p1334_p8 = scmp.ne.s32.totalorder %s1474_s1, %s1333_s11  ;;  %s31_s8 = int_to_ptr.vmem [resolvable:$true] %s30_s8 }
  0x15   :  { %p1337_p9 = scmp.lt.u32.totalorder %s1333_s11, %s1474_s1 }
  0x17   :  { %p1339_p10 = pnand %p1337_p9, %p1334_p8 }
  0x19   :  { %1342 = shalt.err (!%p1339_p10)
}
  0x1a   :  { %s1343_s16 = scalar_lea.vmem %s31_s8, 8192  ;;  %p1348_p12 = scmp.lt.s32.totalorder %s31_s8, %s31_s8 }
  0x1b   :  { %p1344_p11 = scmp.ne.s32.totalorder %s31_s8, %s1343_s16  ;;  %p1349_p13 = scmp.lt.s32.totalorder %s1343_s16, %s1343_s16 }
  0x1d   :  { %p1350_p0 = por %p1349_p13, %p1348_p12 }
  0x1f   :  { %p1351_p1 = pnand %p1350_p0, %p1344_p11 }
  0x21   :  { %1354 = shalt.err (!%p1351_p1)
}
  0x22   :  { %s1387_s0 = smov 64   ;;  %s1388_s17 = smov 4  }
  0x23   :  { %36 = dma.hbm_to_vmem [thread:$0]  %s1474_s1, 8192, %s31_s8, [#allocation6], %s1387_s0, %s1387_s0, %s1388_s17  }
  0x24   :  { %1377 = dma.done.wait [#allocation3], 1024  }
  0x25   :  { %1378 = vsyncadd [#allocation3], 4294966272 }
  0x26   :  { %1379 = dma.done.wait [#allocation6], 8192  }
  0x27   :  { %1380 = vsyncadd [#allocation6], 4294959104  ;;  %v1245_v0 = vld [vmem:[#allocation5 + $0x40] sm:$0xff]   ;;  %v1249_v4 = vld [vmem:[#allocation5 + $0x48] sm:$0xff]   ;;  %vm1391_vm0 = vmmov 0   ;;  %vm785_vm1 = vcmask 130048  }
  0x28   :  { %v1246_v1 = vld [vmem:[#allocation5 + $0xc0] sm:$0xff]   ;;  %1117 = vmatprep.subr.bf16.mxu0 %v1245_v0  ;;  %v1250_v5 = vld [vmem:[#allocation5 + $0xc8] sm:$0xff]   ;;  %v1253_v8 = vld [vmem:[#allocation5 + $0x50] sm:$0xff]   ;;  %vm1025_vm4 = vcmask 64512  }
  0x29   :  { %v1247_v2 = vld [vmem:[#allocation5] sm:$0xff]   ;;  %1139 = vmatprep.subr.bf16.mxu1 %v1246_v1  ;;  %v1251_v6 = vld [vmem:[#allocation5 + $0x8] sm:$0xff]   ;;  %v1254_v9 = vld [vmem:[#allocation5 + $0xd0] sm:$0xff]  }
  0x2a   :  { %v1248_v3 = vld [vmem:[#allocation5 + $0x80] sm:$0xff]   ;;  %1118 = vmatpush3.bf16.msra.mxu0 %v1247_v2  ;;  %v1252_v7 = vld [vmem:[#allocation5 + $0x88] sm:$0xff]   ;;  %v1255_v10 = vld [vmem:[#allocation5 + $0x10] sm:$0xff]  }
  0x2b   :  { %1140 = vmatpush3.bf16.msra.mxu1 %v1248_v3  ;;  %1119 = vmatprep.subr.bf16.mxu0 %v1249_v4  ;;  %v1256_v11 = vld [vmem:[#allocation5 + $0x90] sm:$0xff]   ;;  %v1257_v12 = vld [vmem:[#allocation5 + $0x58] sm:$0xff]   ;;  %v1261_v16 = vld [vmem:[#allocation5 + $0x60] sm:$0xff]  }
  0x2c   :  { %1141 = vmatprep.subr.bf16.mxu1 %v1250_v5  ;;  %v1258_v13 = vld [vmem:[#allocation5 + $0xd8] sm:$0xff]   ;;  %v1262_v17 = vld [vmem:[#allocation5 + $0xe0] sm:$0xff]   ;;  %v1265_v20 = vld [vmem:[#allocation5 + $0x68] sm:$0xff]  }
  0x2d   :  { %v1259_v14 = vld [vmem:[#allocation5 + $0x18] sm:$0xff]   ;;  %v1263_v18 = vld [vmem:[#allocation5 + $0x20] sm:$0xff]   ;;  %v1266_v21 = vld [vmem:[#allocation5 + $0xe8] sm:$0xff]  }
  0x2e   :  { %1120 = vmatpush3.bf16.msra.mxu0 %v1251_v6  ;;  %v1260_v15 = vld [vmem:[#allocation5 + $0x98] sm:$0xff]   ;;  %v1264_v19 = vld [vmem:[#allocation5 + $0xa0] sm:$0xff]   ;;  %v1267_v22 = vld [vmem:[#allocation5 + $0x28] sm:$0xff]  }
  0x2f   :  { %1142 = vmatpush3.bf16.msra.mxu1 %v1252_v7  ;;  %1121 = vmatprep.subr.bf16.mxu0 %v1253_v8  ;;  %v1268_v23 = vld [vmem:[#allocation5 + $0xa8] sm:$0xff]   ;;  %v1269_v24 = vld [vmem:[#allocation5 + $0x70] sm:$0xff]   ;;  %v1273_v28 = vld [vmem:[#allocation5 + $0x78] sm:$0xff]  }
  0x30   :  { %1143 = vmatprep.subr.bf16.mxu1 %v1254_v9  ;;  %v1270_v25 = vld [vmem:[#allocation5 + $0xf0] sm:$0xff]   ;;  %v1274_v29 = vld [vmem:[#allocation5 + $0xf8] sm:$0xff]   ;;  %v50_v32 = vld [vmem:[#allocation2] sm:$0xff] }
  0x31   :  { %v1271_v26 = vld [vmem:[#allocation5 + $0x30] sm:$0xff]   ;;  %v1275_v30 = vld [vmem:[#allocation5 + $0x38] sm:$0xff]   ;;  %v54_v33 = vld [vmem:[#allocation2 + $0x20] sm:$0xff] }
  0x32   :  { %1122 = vmatpush3.bf16.msra.mxu0 %v1255_v10  ;;  %v1272_v27 = vld [vmem:[#allocation5 + $0xb0] sm:$0xff]   ;;  %v1276_v31 = vld [vmem:[#allocation5 + $0xb8] sm:$0xff]   ;;  %v51_v34 = vld [vmem:[#allocation2 + $0x8] sm:$0xff]  ;;  %v1044_v35 = vcombine.low %v50_v32, %v54_v33  ;;  %v1045_v36 = vcombine.high %v50_v32, %v54_v33 }
  0x33   :  { %1144 = vmatpush3.bf16.msra.mxu1 %v1256_v11  ;;  %1123 = vmatprep.subr.bf16.mxu0 %v1257_v12  ;;  %v55_v37 = vld [vmem:[#allocation2 + $0x28] sm:$0xff]  ;;  %v1277_v40 = vld [vmem:[#allocation5 + $0x140] sm:$0xff]   ;;  %v1285_v48 = vld [vmem:[#allocation5 + $0x150] sm:$0xff]  }
  0x34   :  { %1145 = vmatprep.subr.bf16.mxu1 %v1258_v13  ;;  %v1046_v38 = vcombine.low %v51_v34, %v55_v37  ;;  %v1047_v39 = vcombine.high %v51_v34, %v55_v37  ;;  %649 = vmatprep.mubr.bf16.mxu0 %v1045_v36  ;;  %v1278_v41 = vld [vmem:[#allocation5 + $0x1c0] sm:$0xff]   ;;  %v1281_v44 = vld [vmem:[#allocation5 + $0x148] sm:$0xff]   ;;  %v1286_v49 = vld [vmem:[#allocation5 + $0x1d0] sm:$0xff]  }
  0x35   :  { %v1279_v42 = vld [vmem:[#allocation5 + $0x100] sm:$0xff]   ;;  %v1282_v45 = vld [vmem:[#allocation5 + $0x1c8] sm:$0xff]   ;;  %v1287_v50 = vld [vmem:[#allocation5 + $0x110] sm:$0xff]  }
  0x36   :  { %1124 = vmatpush3.bf16.msra.mxu0 %v1259_v14  ;;  %690 = vmatprep.mubr.bf16.mxu1 %v1047_v39  ;;  %v1280_v43 = vld [vmem:[#allocation5 + $0x180] sm:$0xff]   ;;  %v1283_v46 = vld [vmem:[#allocation5 + $0x108] sm:$0xff]   ;;  %v1288_v51 = vld [vmem:[#allocation5 + $0x190] sm:$0xff]  }
  0x37   :  { %1146 = vmatpush3.bf16.msra.mxu1 %v1260_v15  ;;  %1125 = vmatprep.subr.bf16.mxu0 %v1261_v16  ;;  %v1284_v47 = vld [vmem:[#allocation5 + $0x188] sm:$0xff]   ;;  %v1289_v52 = vld [vmem:[#allocation5 + $0x158] sm:$0xff]   ;;  %v1293_v56 = vld [vmem:[#allocation5 + $0x160] sm:$0xff]  }
  0x38   :  { %1147 = vmatprep.subr.bf16.mxu1 %v1262_v17  ;;  %v1290_v53 = vld [vmem:[#allocation5 + $0x1d8] sm:$0xff]   ;;  %v1294_v57 = vld [vmem:[#allocation5 + $0x1e0] sm:$0xff]   ;;  %v1297_v60 = vld [vmem:[#allocation5 + $0x168] sm:$0xff]   ;;  %v1389_v17 = vmov 0  }
  0x39   :  { %v1291_v54 = vld [vmem:[#allocation5 + $0x118] sm:$0xff]   ;;  %v1295_v58 = vld [vmem:[#allocation5 + $0x120] sm:$0xff]   ;;  %v1298_v61 = vld [vmem:[#allocation5 + $0x1e8] sm:$0xff]   ;;  %1244 = vset.pattern.permute.xlu0 %v1389_v17 }
  0x3a   :  { %1126 = vmatpush3.bf16.msra.mxu0 %v1263_v18  ;;  %v1292_v55 = vld [vmem:[#allocation5 + $0x198] sm:$0xff]   ;;  %v1296_v59 = vld [vmem:[#allocation5 + $0x1a0] sm:$0xff]   ;;  %v1299_v62 = vld [vmem:[#allocation5 + $0x128] sm:$0xff]   ;;  %v1390_v18 = vmov 0.0|0.0  }
  0x3b   :  { %1148 = vmatpush3.bf16.msra.mxu1 %v1264_v19  ;;  %1127 = vmatprep.subr.bf16.mxu0 %v1265_v20  ;;  %v1300_v63 = vld [vmem:[#allocation5 + $0x1a8] sm:$0xff]   ;;  %v1301_v0 = vld [vmem:[#allocation5 + $0x170] sm:$0xff]   ;;  %v1305_v4 = vld [vmem:[#allocation5 + $0x178] sm:$0xff]   ;;  %v1392_v19 = vmov 0.0  }
  0x3c   :  { %1149 = vmatprep.subr.bf16.mxu1 %v1266_v21  ;;  %v1302_v1 = vld [vmem:[#allocation5 + $0x1f0] sm:$0xff]   ;;  %v1306_v5 = vld [vmem:[#allocation5 + $0x1f8] sm:$0xff]   ;;  %v783_v16 = vld [vmem:[%s1477_s4] sm:$0xff] }
  0x3d   :  { %v1303_v2 = vld [vmem:[#allocation5 + $0x130] sm:$0xff]   ;;  %v1307_v6 = vld [vmem:[#allocation5 + $0x138] sm:$0xff]   ;;  %861 = vperm.xlu0 %1244, %v783_v16  }
  0x3e   :  { %1128 = vmatpush3.bf16.msra.mxu0 %v1267_v22  ;;  %v1304_v3 = vld [vmem:[#allocation5 + $0x1b0] sm:$0xff]   ;;  %v1308_v7 = vld [vmem:[#allocation5 + $0x1b8] sm:$0xff]   ;;  %v1043_v22 = vld [vmem:[%s1475_s2] ss:$0 sm:$0xff] }
  0x3f   :  { %1150 = vmatpush3.bf16.msra.mxu1 %v1268_v23  ;;  %1129 = vmatprep.subr.bf16.mxu0 %v1269_v24  ;;  %v52_v8 = vld [vmem:[#allocation2 + $0x10] sm:$0xff]  ;;  %v53_v12 = vld [vmem:[#allocation2 + $0x18] sm:$0xff] }
  0x40   :  { %1151 = vmatprep.subr.bf16.mxu1 %v1270_v25  ;;  %v56_v9 = vld [vmem:[#allocation2 + $0x30] sm:$0xff]  ;;  %v57_v13 = vld [vmem:[#allocation2 + $0x38] sm:$0xff] }
  0x41   :  { %v1048_v10 = vcombine.low %v52_v8, %v56_v9  ;;  %v1049_v11 = vcombine.high %v52_v8, %v56_v9  ;;  %v1050_v14 = vcombine.low %v53_v12, %v57_v13  ;;  %v1051_v15 = vcombine.high %v53_v12, %v57_v13 }
  0x42   :  { %1130 = vmatpush3.bf16.msra.mxu0 %v1271_v26 }
  0x43   :  { %1152 = vmatpush3.bf16.msra.mxu1 %v1272_v27  ;;  %1131 = vmatprep.subr.bf16.mxu0 %v1273_v28 }
  0x44   :  { %1153 = vmatprep.subr.bf16.mxu1 %v1274_v29 }
  0x46   :  { %1132 = vmatpush3.bf16.msra.mxu0 %v1275_v30 }
  0x47   :  { %1154 = vmatpush3.bf16.msra.mxu1 %v1276_v31  ;;  %1161 = vmatprep.subr.bf16.mxu0 %v1277_v40 }
  0x48   :  { %1183 = vmatprep.subr.bf16.mxu1 %v1278_v41 }
  0x49   :  { %650 = vmatmul.mubr.bf16.vlgmr.msra.gmra.mrb[0].mxu0 %v1044_v35 }
  0x4a   :  { %691 = vmatmul.mubr.bf16.vlgmr.msra.gmra.mrb[0].mxu1 %v1046_v38  ;;  %1162 = vmatpush3.bf16.msra.mxu0 %v1279_v42 }
  0x4b   :  { %1184 = vmatpush3.bf16.msra.mxu1 %v1280_v43  ;;  %1163 = vmatprep.subr.bf16.mxu0 %v1281_v44 }
  0x4c   :  { %1185 = vmatprep.subr.bf16.mxu1 %v1282_v45  ;;  %731 = vmatprep.mubr.bf16.mxu0 %v1049_v11 }
  0x4d   :  { %772 = vmatprep.mubr.bf16.mxu1 %v1051_v15 }
  0x4e   :  { %1164 = vmatpush3.bf16.msra.mxu0 %v1283_v46 }
  0x4f   :  { %1186 = vmatpush3.bf16.msra.mxu1 %v1284_v47  ;;  %1165 = vmatprep.subr.bf16.mxu0 %v1285_v48 }
  0x50   :  { %1187 = vmatprep.subr.bf16.mxu1 %v1286_v49 }
  0x52   :  { %1166 = vmatpush3.bf16.msra.mxu0 %v1287_v50 }
  0x53   :  { %1188 = vmatpush3.bf16.msra.mxu1 %v1288_v51  ;;  %1167 = vmatprep.subr.bf16.mxu0 %v1289_v52 }
  0x54   :  { %1189 = vmatprep.subr.bf16.mxu1 %v1290_v53 }
  0x56   :  { %1168 = vmatpush3.bf16.msra.mxu0 %v1291_v54 }
  0x57   :  { %1190 = vmatpush3.bf16.msra.mxu1 %v1292_v55  ;;  %1169 = vmatprep.subr.bf16.mxu0 %v1293_v56 }
  0x58   :  { %1191 = vmatprep.subr.bf16.mxu1 %v1294_v57  ;;  %v784_v57 = vld [vmem:[%s1476_s3] sm:$0xff]  ;;  %s1394_s3 = smov [#allocation7]  }
  0x59   :  { %s1033_s23 = sshll.u32 %s1394_s3, 4  ;;  %s1034_s23 = int_to_ptr.vmem [resolvable:$true] %s1033_s23 }
  0x5a   :  { %1170 = vmatpush3.bf16.msra.mxu0 %v1295_v58  ;;  %s1355_s24 = scalar_lea.vmem %s1034_s23, 128  ;;  %p1360_p3 = scmp.lt.s32.totalorder %s1034_s23, %s1034_s23 }
  0x5b   :  { %1192 = vmatpush3.bf16.msra.mxu1 %v1296_v59  ;;  %1171 = vmatprep.subr.bf16.mxu0 %v1297_v60  ;;  %p1356_p2 = scmp.ne.s32.totalorder %s1034_s23, %s1355_s24  ;;  %p1361_p4 = scmp.lt.s32.totalorder %s1355_s24, %s1355_s24 }
  0x5c   :  { %1193 = vmatprep.subr.bf16.mxu1 %v1298_v61 }
  0x5d   :  { %p1362_p5 = por %p1361_p4, %p1360_p3 }
  0x5e   :  { %1172 = vmatpush3.bf16.msra.mxu0 %v1299_v62 }
  0x5f   :  { %1194 = vmatpush3.bf16.msra.mxu1 %v1300_v63  ;;  %1173 = vmatprep.subr.bf16.mxu0 %v1301_v0  ;;  %v1393_v63 = vmov 1.0   ;;  %v1009_v0 = vlaneseq  ;;  %p1363_p6 = pnand %p1362_p5, %p1356_p2 }
  0x60   :  { %1195 = vmatprep.subr.bf16.mxu1 %v1302_v1 }
  0x61   :  { %v1010_v1 = vshrl.u32 %v1009_v0, 7 }
  0x62   :  { %1174 = vmatpush3.bf16.msra.mxu0 %v1303_v2 }
  0x63   :  { %1196 = vmatpush3.bf16.msra.mxu1 %v1304_v3  ;;  %1175 = vmatprep.subr.bf16.mxu0 %v1305_v4  ;;  %v1011_v2 = vsub.s32 0, %v1010_v1 }
  0x64   :  { %1197 = vmatprep.subr.bf16.mxu1 %v1306_v5 }
  0x66   :  { %1176 = vmatpush3.bf16.msra.mxu0 %v1307_v6 }
  0x67   :  { %1198 = vmatpush3.bf16.msra.mxu1 %v1308_v7  ;;  %1229 = vmatprep.subr.bf16.mxu0 %v1390_v18 }
  0x68   :  { %1219 = vmatprep.subr.mxu1 %v1392_v19 }
  0x69   :  { %732 = vmatmul.mubr.bf16.vlgmr.msra.gmra.mrb[4].mxu0 %v1048_v10 }
  0x6a   :  { %773 = vmatmul.mubr.bf16.vlgmr.msra.gmra.mrb[4].mxu1 %v1050_v14  ;;  %1216 = vmatprep.mubr.msk.f32.mxu0 %vm1391_vm0, %v1392_v19 }
  0x6b   :  { %1221 = vmatprep.mubr.msk.f32.mxu1 %vm1391_vm0, %v1392_v19 }
  0xbc   :  { %v862_v58 = vpop.permute.xlu0 %861 }
 0x11c   :  { %v1133_v20 = vpop.f32.mrb[0].mxu0 }
 0x11d   :  { %v1155_v21 = vpop.f32.mrb[0].mxu1  ;;  %v1134_v23 = vpop.f32.mrb[1].mxu0 }
 0x11e   :  { %v1135_v24 = vadd.f32 %v1134_v23, %v1133_v20  ;;  %v1156_v25 = vpop.f32.mrb[1].mxu1  ;;  %v1136_v26 = vpop.f32.mrb[2].mxu0 }
 0x11f   :  { %v1157_v27 = vadd.f32 %v1156_v25, %v1155_v21  ;;  %v1158_v28 = vpop.f32.mrb[2].mxu1  ;;  %v1137_v29 = vpop.f32.mrb[3].mxu0 }
 0x120   :  { %v652_v30 = vadd.f32 %v1135_v24, %v1043_v22  ;;  %v1138_v31 = vadd.f32 %v1137_v29, %v1136_v26  ;;  %v1159_v32 = vpop.f32.mrb[3].mxu1 }
 0x121   :  { %v1160_v33 = vadd.f32 %v1159_v32, %v1158_v28 }
 0x122   :  { %v693_v34 = vadd.f32 %v1157_v27, %v652_v30  ;;  %v655_v35 = vadd.f32 %v1138_v31, %v1043_v22 }
 0x124   :  { %v696_v36 = vadd.f32 %v1160_v33, %v655_v35 }
 0x13c   :  { %v1177_v37 = vpop.f32.mrb[4].mxu0 }
 0x13d   :  { %v1199_v38 = vpop.f32.mrb[4].mxu1  ;;  %v1178_v39 = vpop.f32.mrb[5].mxu0 }
 0x13e   :  { %v1179_v40 = vadd.f32 %v1178_v39, %v1177_v37  ;;  %v1200_v41 = vpop.f32.mrb[5].mxu1  ;;  %v1180_v42 = vpop.f32.mrb[6].mxu0 }
 0x13f   :  { %v1201_v43 = vadd.f32 %v1200_v41, %v1199_v38  ;;  %v1202_v44 = vpop.f32.mrb[6].mxu1  ;;  %v1181_v45 = vpop.f32.mrb[7].mxu0 }
 0x140   :  { %v734_v46 = vadd.f32 %v1179_v40, %v693_v34  ;;  %v1182_v47 = vadd.f32 %v1181_v45, %v1180_v42  ;;  %v1203_v48 = vpop.f32.mrb[7].mxu1 }
 0x141   :  { %v1204_v49 = vadd.f32 %v1203_v48, %v1202_v44 }
 0x142   :  { %v775_v50 = vadd.f32 %v1201_v43, %v734_v46  ;;  %v737_v51 = vadd.f32 %v1182_v47, %v696_v36 }
 0x144   :  { %v781_v52 = vmax.f32 %v775_v50, 0.0  ;;  %v778_v53 = vadd.f32 %v1204_v49, %v737_v51 }
 0x146   :  { %v782_v54 = vmax.f32 %v778_v53, 0.0  ;;  %v865_v55 = vmul.f32 %v781_v52, %v781_v52 }
 0x148   :  { %v1230_v56 = vpack.c.bf16 %v782_v54, %v781_v52  ;;  %866 = vadd.xlane.f32.xlu0 %v865_v55 }
 0x14a   :  { %1231 = vmatpush3.bf16.msra.mxu0 %v1230_v56 }
 0x14b   :  { %1224 = vmatprep.subr.mxu0 %v1392_v19 }
 0x14d   :  { %1217 = vmatmul.mubr.msk.f32.vlgmr.msra.gmra.mrb[8].mxu0 %vm785_vm1, %v784_v57 }
 0x14e   :  { %1226 = vmatprep.mubr.msk.f32.mxu0 %vm1391_vm0, %v1392_v19 }
 0x1d5   :  { %v867_v8 = vpop.xlane.xlu0 %866 }
 0x220   :  { %v855_v59 = vpop.f32.mrb[8].mxu0 }
 0x221   :  { %v864_v60 = vmul.f32 %v862_v58, %v855_v59  ;;  %v1218_v61 = vpop.f32.mrb[9].mxu0 }
 0x223   :  { %v868_v62 = vmul.f32 %v864_v60, %v864_v60  ;;  %1225 = vmatpush3.xpose.msra.mxu0 %v864_v60 }
 0x225   :  { %1220 = vmatpush3.xpose.msra.mxu1 %v868_v62 }
 0x226   :  { %1227 = vmatmul.mubr.f32.vlgmr.msra.gmra.mrb[10].mxu0 %v781_v52 }
 0x228   :  { %1222 = vmatmul.mubr.f32.vlgmr.msra.gmra.mrb[8].mxu1 %v1393_v63 }
 0x2f9   :  { %v1005_v3 = vpop.f32.mrb[10].mxu0 }
 0x2fa   :  { %v1228_v4 = vpop.f32.mrb[11].mxu0  ;;  %v1014_v9 = vmul.f32 2.0, %v1005_v3 }
 0x2fb   :  { %v935_v5 = vpop.f32.mrb[8].mxu1 }
 0x2fc   :  { %v1012_v6 = vrot.slane %v935_v5, %v1011_v2  ;;  %v1223_v7 = vpop.f32.mrb[9].mxu1 }
 0x2fe   :  { %v1013_v10 = vadd.f32 %v1012_v6, %v867_v8 }
 0x300   :  { %v1015_v11 = vsub.f32 %v1013_v10, %v1014_v9 }
 0x302   :  { %v1016_v12 = vmax.f32 %v1015_v11, 0.0 }
 0x304   :  { %1309 = vrsqrt.f32 %v1016_v12  ;;  %vm1019_vm2 = vcmp.eq.f32.partialorder %v1016_v12, inf  ;;  %v1022_v15 = vand.u32 2147483648, %v1016_v12  ;;  %vm1021_vm3 = vcmp.eq.f32.partialorder %v1016_v12, 0.0 }
 0x30e   :  { %v1310_v13 = vpop.eup %1309 }
 0x30f   :  { %v1018_v14 = vmul.f32 %v1310_v13, %v1016_v12 }
 0x311   :  { %v1020_v16 = vsel %vm1019_vm2, %v1016_v12, %v1018_v14 }
 0x312   :  { %v1023_v17 = vsel %vm1021_vm3, %v1022_v15, %v1020_v16 }
 0x313   :  { %v1024_v18 = vsub.f32 0.0, %v1023_v17 }
 0x315   :  { %1026 = vst.msk [vmem:[#allocation7] sm:$0xff] %vm1025_vm4, %v1024_v18 }
 0x316   :  { %1366 = shalt.err (!%p1363_p6)
}
 0x317   :  { %s1367_s27 = scalar_lea.hbm %s1478_s5, 128 }
 0x318   :  { %p1368_p7 = scmp.ne.s32.totalorder %s1478_s5, %s1367_s27  ;;  %p1371_p8 = scmp.lt.u32.totalorder %s1367_s27, %s1478_s5 }
 0x31a   :  { %p1373_p9 = pnand %p1371_p8, %p1368_p7 }
 0x31c   :  { %1376 = shalt.err (!%p1373_p9)
}
 0x31d   :  { %1036 = dma.vmem_to_hbm [thread:$0]  %s1034_s23, 128, %s1478_s5, [#allocation4]  }
 0x31e   :  { %1381 = dma.done.wait [#allocation4], 128  }
 0x31f   :  { %1382 = vsyncadd [#allocation4], 4294967168 }
 0x320   :  { %1040 = vsyncpa [#allocation3], 1 }
 0x321   :  { %1041 = vsyncpa [#allocation6], 1 }
 0x322   :  { %1042 = vsyncpa [#allocation4], 1 }

</bundles_post_ra>
